<compile_context>
chip_gen: v7x
topology: tpu7x:2x2x1
jax: 0.10.0
libtpu: 0.0.40
codegen_flags: <defaults>
</compile_context>

<pallas_src>
import math

import jax
import jax.numpy as jnp
from jax.experimental import pallas as pl
from jax.experimental.pallas import tpu as pltpu


def _affine_kernel(gamma_ref, beta_ref, x_ref, o_ref):
    # Pure VPU elementwise work; (1, L) params broadcast over the (rows, L) tile.
    o_ref[...] = x_ref[...] * gamma_ref[...] + beta_ref[...]


def _fold_group(C, max_lane_elems=8192):
    """Smallest row-group g with (C*g) % 128 == 0 (lane-dense last dim).

    If the resulting width would be unreasonably large (only possible when C is
    already wide, i.e. >= 128-ish), keep the natural layout (g = 1): the bulk of
    a wide last dim is unmasked anyway.
    """
    g = math.lcm(C, 128) // C
    if C * g > max_lane_elems:
        return 1
    return g


def affine(x, gamma, beta, *, row_tile=None,
           target_block_bytes=4 * 1024 * 1024, donate_x=False):
    """y = gamma * x + beta, gamma/beta of shape S, x of shape (..., *S)."""
    orig_shape = x.shape
    feat_shape = gamma.shape
    assert beta.shape == feat_shape
    C = 1
    for d in feat_shape:
        C *= int(d)
    assert orig_shape[len(orig_shape) - len(feat_shape):] == feat_shape, (
        "trailing dims of x must match gamma/beta shape")

    if gamma.dtype != x.dtype:
        gamma = gamma.astype(x.dtype)
    if beta.dtype != x.dtype:
        beta = beta.astype(x.dtype)

    M = x.size // C

    # --- lane-dense fold: flat stream -> (M_rows, L), L = lcm(C, 128) --------
    g = _fold_group(C)
    L = C * g
    n_elems = M * C
    n_pad = (-n_elems) % L           # at most (g-1)*C dummy elements
    x_flat = x.reshape(-1)
    if n_pad:
        x_flat = jnp.pad(x_flat, (0, n_pad))
    M_rows = (n_elems + n_pad) // L
    x2d = x_flat.reshape(M_rows, L)

    # Resident (1, L) params: g copies of gamma/beta along lanes.
    g2d = jnp.tile(gamma.reshape(-1), g).reshape(1, L)
    b2d = jnp.tile(beta.reshape(-1), g).reshape(1, L)

    # --- row tiling: ~target_block_bytes per x block, sublane-aligned --------
    itemsize = jnp.dtype(x.dtype).itemsize
    sublane = max(8, 32 // itemsize)  # 8 (f32) / 16 (bf16) / 32 (int8)
    if row_tile is None:
        rows_target = max(sublane, target_block_bytes // max(1, L * itemsize))
        row_tile = max(sublane, (rows_target // sublane) * sublane)
    else:
        row_tile = max(sublane, (row_tile // sublane) * sublane)

    if row_tile >= M_rows:
        if M_rows >= 2 * sublane:
            # Split into >= 2 grid steps so ("parallel",) can use both TCs on v7x.
            half = pl.cdiv(M_rows, 2)
            row_tile = min(((half + sublane - 1) // sublane) * sublane, M_rows - 1)
            row_tile = max(sublane, row_tile)
        else:
            # Tiny input: single full-extent block (exempt from (8,128) rule).
            row_tile = M_rows

    grid = (pl.cdiv(M_rows, row_tile),)

    # Explicit scoped-VMEM budget: double-buffered x block + out block + params
    # + headroom; stays well inside v5e (16 MiB default) / v7x (64 MiB physical).
    block_bytes = row_tile * L * itemsize
    param_bytes = 2 * 2 * L * itemsize
    vmem_limit = int(min(2 * 2 * block_bytes + param_bytes + (2 << 20),
                         48 * 1024 * 1024))

    cost = pl.CostEstimate(
        flops=2 * M * C,
        transcendentals=0,
        bytes_accessed=2 * M_rows * L * itemsize + 2 * L * itemsize,
    )

    out2d = pl.pallas_call(
        _affine_kernel,
        out_shape=jax.ShapeDtypeStruct((M_rows, L), x.dtype),
        grid_spec=pltpu.PrefetchScalarGridSpec(
            num_scalar_prefetch=0,
            grid=grid,
            in_specs=[
                pl.BlockSpec((1, L), lambda i: (0, 0)),          # gamma (resident)
                pl.BlockSpec((1, L), lambda i: (0, 0)),          # beta  (resident)
                pl.BlockSpec((row_tile, L), lambda i: (i, 0)),   # x tile
            ],
            out_specs=pl.BlockSpec((row_tile, L), lambda i: (i, 0)),
        ),
        compiler_params=pltpu.CompilerParams(
            dimension_semantics=("parallel",),
            vmem_limit_bytes=vmem_limit,
        ),
        cost_estimate=cost,
        input_output_aliases=({2: 0} if donate_x else {}),
    )(g2d, b2d, x2d)

    out_flat = out2d.reshape(-1)
    if n_pad:
        out_flat = out_flat[:n_elems]
    return out_flat.reshape(orig_shape)


if __name__ == "__main__":
    # Module config: out_neurons = hidden = 32, init_gamma = 0.1, init_beta = 0.
    B, T, C = 2, 8, 32
    init_gamma, init_beta = 0.1, 0.0

    key = jax.random.PRNGKey(0)
    x = jax.random.normal(key, (B, T, C), dtype=jnp.float32)

    # Deterministic parameter init, same as nn.init.constant_ in the module.
    gamma = jnp.full((C,), init_gamma, dtype=jnp.float32)
    beta = jnp.full((C,), init_beta, dtype=jnp.float32)

    y = affine(x, gamma, beta)
    y = jax.block_until_ready(y)

    y_ref = gamma * x + beta
    assert y.shape == x.shape and y.dtype == x.dtype
    assert jnp.allclose(y, y_ref, atol=1e-6, rtol=1e-6)

    # Second check: shape large enough to exercise the lane-dense fold
    # (L = 128), a multi-step pipelined grid, and the >=2-step split.
    key2 = jax.random.PRNGKey(0)
    x2 = jax.random.normal(key2, (8, 4096, C), dtype=jnp.float32)
    y2 = jax.block_until_ready(affine(x2, gamma, beta))
    y2_ref = gamma * x2 + beta
    assert jnp.allclose(y2, y2_ref, atol=1e-6, rtol=1e-6)

    # Third check: M not divisible by the fold group -> pad path (M=18, g=4).
    key3 = jax.random.PRNGKey(0)
    x3 = jax.random.normal(key3, (3, 6, C), dtype=jnp.float32)
    y3 = jax.block_until_ready(affine(x3, gamma, beta))
    y3_ref = gamma * x3 + beta
    assert y3.shape == x3.shape
    assert jnp.allclose(y3, y3_ref, atol=1e-6, rtol=1e-6)

    print("KERNEL_OK")
</pallas_src>

<mosaic_0001>
module attributes {stable_mosaic.version = 11 : i64} {
  func.func @_affine_kernel(%arg0: i32, %arg1: memref<1x128xf32, #tpu.memory_space<vmem>>, %arg2: memref<1x128xf32, #tpu.memory_space<vmem>>, %arg3: memref<4x128xf32, #tpu.memory_space<vmem>>, %arg4: memref<4x128xf32, #tpu.memory_space<vmem>>) attributes {dimension_semantics = [#tpu.dimension_semantics<parallel>], iteration_bounds = array<i64: 1>, scalar_prefetch = 0 : i64, scratch_operands = 0 : i64, tpu.core_type = #tpu.core_type<tc>, window_params = [{pipeline_mode = #tpu.pipeline_mode<synchronous>, transform_indices = @transform_0, window_bounds = array<i64: 1, 128>}, {pipeline_mode = #tpu.pipeline_mode<synchronous>, transform_indices = @transform_1, window_bounds = array<i64: 1, 128>}, {transform_indices = @transform_2, window_bounds = array<i64: 4, 128>}, {transform_indices = @transform_3, window_bounds = array<i64: 4, 128>}]} {
    %c0 = arith.constant 0 : index
    %c0_0 = arith.constant 0 : index
    %0 = vector.load %arg3[%c0, %c0_0] : memref<4x128xf32, #tpu.memory_space<vmem>>, vector<4x128xf32>
    %c0_1 = arith.constant 0 : index
    %c0_2 = arith.constant 0 : index
    %1 = vector.load %arg1[%c0_1, %c0_2] : memref<1x128xf32, #tpu.memory_space<vmem>>, vector<1x128xf32>
    %2 = vector.broadcast %1 : vector<1x128xf32> to vector<4x128xf32>
    %3 = arith.mulf %0, %2 : vector<4x128xf32>
    %c0_3 = arith.constant 0 : index
    %c0_4 = arith.constant 0 : index
    %4 = vector.load %arg2[%c0_3, %c0_4] : memref<1x128xf32, #tpu.memory_space<vmem>>, vector<1x128xf32>
    %5 = vector.broadcast %4 : vector<1x128xf32> to vector<4x128xf32>
    %6 = arith.addf %3, %5 : vector<4x128xf32>
    %c0_5 = arith.constant 0 : index
    %c0_6 = arith.constant 0 : index
    %7 = vector.load %arg4[%c0_5, %c0_6] : memref<4x128xf32, #tpu.memory_space<vmem>>, vector<4x128xf32>
    tpu.vector_store %arg4[%c0_5, %c0_6], %6 {strides = array<i32>} : memref<4x128xf32, #tpu.memory_space<vmem>>, vector<4x128xf32>,
    return
  }
  func.func @transform_0(%arg0: i32) -> (i32, i32) {
    %c0_i32 = arith.constant 0 : i32
    %c0_i32_0 = arith.constant 0 : i32
    %c0_i32_1 = arith.constant 0 : i32
    return %c0_i32, %c0_i32_0 : i32, i32
  }
  func.func @transform_1(%arg0: i32) -> (i32, i32) {
    %c0_i32 = arith.constant 0 : i32
    %c0_i32_0 = arith.constant 0 : i32
    %c0_i32_1 = arith.constant 0 : i32
    return %c0_i32, %c0_i32_0 : i32, i32
  }
  func.func @transform_2(%arg0: i32) -> (i32, i32) {
    %c0_i32 = arith.constant 0 : i32
    %c0_i32_0 = arith.constant 0 : i32
    return %arg0, %c0_i32 : i32, i32
  }
  func.func @transform_3(%arg0: i32) -> (i32, i32) {
    %c0_i32 = arith.constant 0 : i32
    %c0_i32_0 = arith.constant 0 : i32
    return %arg0, %c0_i32 : i32, i32
  }
}

</mosaic_0001>

<bundles_post_ra>
// kernel: tpu_custom_call.1
= control target key start
LH: loop header
LB: loop body
LE: loop exit
PB: predicated region body
PF: predicated region fallthrough
CT: control target
= control target key end

     0   :  { %8 = vsyncpa [#allocation3], 0  ;;  %s164_s0 = inlined_call_operand.hbm [shape: f32[1,128], index: 0, kind: input, shape index: {}]   ;;  %s165_s1 = inlined_call_operand.vmem [shape: f32[1,128], index: 1, kind: input, shape index: {}]   ;;  %s166_s2 = inlined_call_operand.vmem [shape: f32[4,128], index: 2, kind: input, shape index: {}]   ;;  %s167_s3 = inlined_call_operand.hbm [shape: f32[4,128], index: 3, kind: output, shape index: {}]  }
   0x1   :  { %9 = vsyncpa [#allocation4], 0  ;;  %s112_s12 = smov [#allocation2]   ;;  %s64_s16 = scalar_lea.hbm %s164_s0, 16 }
   0x2   :  { %s16_s13 = sshll.u32 %s112_s12, 4  ;;  %p65_p0 = scmp.ne.s32.totalorder %s164_s0, %s64_s16  ;;  %s17_s13 = int_to_ptr.vmem [resolvable:$true] %s16_s13 }
   0x3   :  { %p68_p1 = scmp.lt.u32.totalorder %s64_s16, %s164_s0 }
   0x5   :  { %p70_p2 = pnand %p68_p1, %p65_p0 }
   0x7   :  { %73 = shalt.err (!%p70_p2)
}
   0x8   :  { %s74_s21 = scalar_lea.vmem %s17_s13, 16  ;;  %s78_s22 = scalar_lea.vmem %s17_s13, 32 }
   0x9   :  { %p75_p3 = scmp.ne.s32.totalorder %s17_s13, %s74_s21  ;;  %p79_p4 = scmp.lt.s32.totalorder %s17_s13, %s17_s13 }
   0xa   :  { %p80_p5 = scmp.lt.s32.totalorder %s78_s22, %s74_s21 }
   0xc   :  { %p81_p6 = por %p80_p5, %p79_p4 }
   0xe   :  { %p82_p7 = pnand %p81_p6, %p75_p3 }
  0x10   :  { %85 = shalt.err (!%p82_p7)
}
  0x11   :  { %19 = dma.hbm_to_vmem [thread:$0]  %s164_s0, 16, %s17_s13, [#allocation3]  }
  0x12   :  { %108 = dma.done.wait [#allocation3], 16  }
  0x13   :  { %109 = vsyncadd [#allocation3], 4294967280  ;;  %s113_s25 = smov [#allocation5]   ;;  %v27_v0 = vld [vmem:[%s166_s2] sm:$0xf] }
  0x14   :  { %s51_s26 = sshll.u32 %s113_s25, 4  ;;  %v60_v1 = vld [vmem:[#allocation2] ss:$0 sm:$0xff]  ;;  %v61_v2 = vld [vmem:[%s165_s1] ss:$0 sm:$0xff]  ;;  %s52_s26 = int_to_ptr.vmem [resolvable:$true] %s51_s26 }
  0x15   :  { %v35_v3 = vmul.f32 %v60_v1, %v27_v0  ;;  %s86_s4 = scalar_lea.vmem %s52_s26, 64  ;;  %p91_p9 = scmp.lt.s32.totalorder %s52_s26, %s52_s26 }
  0x16   :  { %p87_p8 = scmp.ne.s32.totalorder %s52_s26, %s86_s4  ;;  %p92_p10 = scmp.lt.s32.totalorder %s86_s4, %s86_s4 }
  0x17   :  { %v43_v4 = vadd.f32 %v61_v2, %v35_v3 }
  0x18   :  { %p93_p11 = por %p92_p10, %p91_p9 }
  0x19   :  { %44 = vst [vmem:[#allocation5] sm:$0xf] %v43_v4 }
  0x1a   :  { %p94_p12 = pnand %p93_p11, %p87_p8 }
  0x1c   :  { %97 = shalt.err (!%p94_p12)
}
  0x1d   :  { %s98_s2 = scalar_lea.hbm %s167_s3, 64 }
  0x1e   :  { %p99_p13 = scmp.ne.s32.totalorder %s167_s3, %s98_s2  ;;  %p102_p0 = scmp.lt.u32.totalorder %s98_s2, %s167_s3 }
  0x20   :  { %p104_p1 = pnand %p102_p0, %p99_p13 }
  0x22   :  { %107 = shalt.err (!%p104_p1)
}
  0x23   :  { %54 = dma.vmem_to_hbm [thread:$0]  %s52_s26, 64, %s167_s3, [#allocation4]  }
  0x24   :  { %110 = dma.done.wait [#allocation4], 64  }
  0x25   :  { %111 = vsyncadd [#allocation4], 4294967232 }
  0x26   :  { %58 = vsyncpa [#allocation3], 1 }
  0x27   :  { %59 = vsyncpa [#allocation4], 1 }

</bundles_post_ra>
